<compile_context>
chip_gen: v5e
topology: v5e:2x2
jax: 0.10.0
libtpu: 0.0.40
codegen_flags: <defaults>
</compile_context>

<pallas_src>
import jax
import jax.numpy as jnp
from jax.experimental import pallas as pl
from jax.experimental.pallas import tpu as pltpu


def _gpw_kernel(x_ref, w_ref, o_ref):
    """x_ref: (1, C, T) native dtype; w_ref: (C, heads*p) f32;
    o_ref: (1, heads, T, p) f32."""
    heads, p = o_ref.shape[1], o_ref.shape[3]
    # Fused permute(0,2,3,1) + .float(): widen and transpose the NCHW tile in
    # VMEM (XLU/VPU work hidden under the DMAs -- no extra HBM pass).
    xt = x_ref[0].astype(jnp.float32).T                                # (T, C)
    # One lane-dense MXU contraction over all heads at once, f32 accumulation.
    y = jnp.dot(xt, w_ref[...], preferred_element_type=jnp.float32)   # (T, heads*p)
    # Store head-wise so HBM already holds the (b, heads, hw, p) layout.
    for n in range(heads):                       # static unroll, heads is small
        o_ref[0, n] = y[:, n * p:(n + 1) * p]    # (T, p), p kept as last dim


def group_pointwise_forward(x_nchw, w, *, tile_hw=512,
                            vmem_budget_bytes=40 * 1024 * 1024):
    """x_nchw: (b, c, h, w) any float dtype; w: (c, heads, p) float32.

    Returns (b, heads, h, w, p) float32, matching GroupPointWise.forward.
    """
    b, c, h, wd = x_nchw.shape
    c_w, heads, p = w.shape
    assert c_w == c, "weight/input channel mismatch"

    HW = h * wd
    NP = heads * p

    # Free reshapes (merge adjacent row-major dims): no HBM pass.
    x3d = x_nchw.reshape(b, c, HW)
    w2d = w.reshape(c, NP).astype(jnp.float32)

    # Degenerate / unaligned channel counts (e.g. the c=4 demo): zero-pad C to
    # the 8-sublane width so the in-kernel transpose and the MXU K dim are
    # aligned.  Zero channels hit zero weight rows, so results are unchanged.
    # Typical channel counts are multiples of 8 and skip this entirely.
    if c % 8 != 0:
        c_pad = ((c + 7) // 8) * 8
        x3d = jnp.pad(x3d, ((0, 0), (0, c_pad - c), (0, 0)))
        w2d = jnp.pad(w2d, ((0, c_pad - c), (0, 0)))
    else:
        c_pad = c

    x_itemsize = jnp.dtype(x3d.dtype).itemsize

    def step_vmem_bytes(t):
        x_blk = c_pad * t * x_itemsize           # input tile (native dtype)
        w_blk = c_pad * NP * 4                   # resident weight
        o_blk = heads * t * p * 4                # output tile
        temps = 2 * c_pad * t * 4 + t * NP * 4   # widened + transposed x, y
        return 2 * (x_blk + w_blk + o_blk) + temps   # 2x: double-buffered pipeline

    # Spatial tile: full extent if small, else a multiple of 128 (default 512,
    # 256-aligned for the v6e/v7x MXU), shrunk to respect the VMEM budget.
    if HW <= tile_hw:
        t = HW
    else:
        t = max(128, (tile_hw // 128) * 128)
        while t > 128 and step_vmem_bytes(t) > vmem_budget_bytes:
            t //= 2

    # Raise scoped VMEM for big tiles; stay well under v7x's 64 MiB physical
    # VMEM (v5e/v6e have 128 MiB, so this cap is safe everywhere).
    vmem_limit = int(min(max(2 * step_vmem_bytes(t), 32 * 1024 * 1024),
                         48 * 1024 * 1024))

    grid = (b, pl.cdiv(HW, t))

    out4d = pl.pallas_call(
        _gpw_kernel,
        out_shape=jax.ShapeDtypeStruct((b, heads, HW, p), jnp.float32),
        grid_spec=pltpu.PrefetchScalarGridSpec(
            num_scalar_prefetch=0,
            grid=grid,
            in_specs=[
                # NCHW activation tile (1, C, tile_hw), read in native dtype.
                pl.BlockSpec((1, c_pad, t), lambda bi, ti: (bi, 0, ti)),
                # Full weight, resident every step (constant index_map, so the
                # pipeline does not re-copy it between grid steps).
                pl.BlockSpec((c_pad, NP), lambda bi, ti: (0, 0)),
            ],
            # Output written by the kernel directly in (b, heads, hw, p) layout.
            out_specs=pl.BlockSpec((1, heads, t, p),
                                   lambda bi, ti: (bi, 0, ti, 0)),
        ),
        compiler_params=pltpu.CompilerParams(
            dimension_semantics=("parallel", "parallel"),
            vmem_limit_bytes=vmem_limit,
        ),
    )(x3d, w2d)

    # Free reshape: split hw back into (h, w) -> (b, heads, h, w, p).
    return out4d.reshape(b, heads, h, wd, p)


def make_params(key, in_channels, heads=4, proj_factor=1, target_dimension=None):
    if target_dimension is not None:
        proj_channels = target_dimension // proj_factor
    else:
        proj_channels = in_channels // proj_factor
    assert proj_channels % heads == 0, "proj_channels must be divisible by heads"
    p = proj_channels // heads
    # nn.init.normal_(self.w, std=0.01)
    w = 0.01 * jax.random.normal(key, (in_channels, heads, p), dtype=jnp.float32)
    return w


if __name__ == "__main__":
    key = jax.random.PRNGKey(0)
    k_x, k_w = jax.random.split(key)

    # Small shapes consistent with the module: batch=2, channels=4, spatial=16.
    b, c, h, wd = 2, 4, 16, 16
    heads, proj_factor = 4, 1

    x = jax.random.normal(k_x, (b, c, h, wd), dtype=jnp.float32)
    w = make_params(k_w, in_channels=c, heads=heads, proj_factor=proj_factor)

    out = group_pointwise_forward(x, w)
    out = jax.block_until_ready(out)

    # Reference check (plain JAX einsum, same semantics as torch.einsum).
    x_bhwc = jnp.transpose(x, (0, 2, 3, 1)).astype(jnp.float32)
    ref = jnp.einsum("bhwc,cnp->bnhwp", x_bhwc, w)
    assert out.shape == ref.shape == (b, heads, h, wd, w.shape[-1])
    assert jnp.allclose(out, ref, atol=1e-5, rtol=1e-5)

    print("KERNEL_OK")
</pallas_src>

<mosaic_0001>
module attributes {stable_mosaic.version = 11 : i64} {
  func.func @_gpw_kernel(%arg0: i32, %arg1: i32, %arg2: memref<1x8x256xf32, #tpu.memory_space<vmem>>, %arg3: memref<8x4xf32, #tpu.memory_space<vmem>>, %arg4: memref<1x4x256x1xf32, #tpu.memory_space<vmem>>) attributes {dimension_semantics = [#tpu.dimension_semantics<parallel>, #tpu.dimension_semantics<parallel>], iteration_bounds = array<i64: 2, 1>, scalar_prefetch = 0 : i64, scratch_operands = 0 : i64, tpu.core_type = #tpu.core_type<tc>, window_params = [{transform_indices = @transform_0, window_bounds = array<i64: 1, 8, 256>}, {pipeline_mode = #tpu.pipeline_mode<synchronous>, transform_indices = @transform_1, window_bounds = array<i64: 8, 4>}, {transform_indices = @transform_2, window_bounds = array<i64: 1, 4, 256, 1>}]} {
    %c0 = arith.constant 0 : index
    %c0_0 = arith.constant 0 : index
    %c0_1 = arith.constant 0 : index
    %0 = vector.load %arg2[%c0, %c0_0, %c0_1] : memref<1x8x256xf32, #tpu.memory_space<vmem>>, vector<1x8x256xf32>
    %1 = vector.shape_cast %0 : vector<1x8x256xf32> to vector<8x256xf32>
    %2 = tpu.transpose %1, [1, 0] : vector<8x256xf32> -> vector<256x8xf32>
    %c0_2 = arith.constant 0 : index
    %c0_3 = arith.constant 0 : index
    %3 = vector.load %arg3[%c0_2, %c0_3] : memref<8x4xf32, #tpu.memory_space<vmem>>, vector<8x4xf32>
    %cst = arith.constant dense<0.000000e+00> : vector<256x4xf32>
    %4 = tpu.matmul %2, %3, %cst {dimension_numbers = #tpu.dot_dimension_numbers<[1], [0], [0], [1], [0, 0, 1, 1], [], []>} : vector<256x8xf32>, vector<8x4xf32>, vector<256x4xf32> -> vector<256x4xf32>
    %5 = vector.extract_strided_slice %4 {offsets = [0, 0], sizes = [256, 1], strides = [1, 1]} : vector<256x4xf32> to vector<256x1xf32>
    %c0_4 = arith.constant 0 : index
    %c0_5 = arith.constant 0 : index
    %c0_6 = arith.constant 0 : index
    %c0_7 = arith.constant 0 : index
    %6 = vector.load %arg4[%c0_4, %c0_5, %c0_6, %c0_7] : memref<1x4x256x1xf32, #tpu.memory_space<vmem>>, vector<1x1x256x1xf32>
    %7 = vector.shape_cast %6 : vector<1x1x256x1xf32> to vector<256x1xf32>
    %8 = vector.shape_cast %5 : vector<256x1xf32> to vector<1x1x256x1xf32>
    tpu.vector_store %arg4[%c0_4, %c0_5, %c0_6, %c0_7], %8 {strides = array<i32>} : memref<1x4x256x1xf32, #tpu.memory_space<vmem>>, vector<1x1x256x1xf32>,
    %9 = vector.extract_strided_slice %4 {offsets = [0, 1], sizes = [256, 1], strides = [1, 1]} : vector<256x4xf32> to vector<256x1xf32>
    %c0_8 = arith.constant 0 : index
    %c1 = arith.constant 1 : index
    %c0_9 = arith.constant 0 : index
    %c0_10 = arith.constant 0 : index
    %10 = vector.load %arg4[%c0_8, %c1, %c0_9, %c0_10] : memref<1x4x256x1xf32, #tpu.memory_space<vmem>>, vector<1x1x256x1xf32>
    %11 = vector.shape_cast %10 : vector<1x1x256x1xf32> to vector<256x1xf32>
    %12 = vector.shape_cast %9 : vector<256x1xf32> to vector<1x1x256x1xf32>
    tpu.vector_store %arg4[%c0_8, %c1, %c0_9, %c0_10], %12 {strides = array<i32>} : memref<1x4x256x1xf32, #tpu.memory_space<vmem>>, vector<1x1x256x1xf32>,
    %13 = vector.extract_strided_slice %4 {offsets = [0, 2], sizes = [256, 1], strides = [1, 1]} : vector<256x4xf32> to vector<256x1xf32>
    %c0_11 = arith.constant 0 : index
    %c2 = arith.constant 2 : index
    %c0_12 = arith.constant 0 : index
    %c0_13 = arith.constant 0 : index
    %14 = vector.load %arg4[%c0_11, %c2, %c0_12, %c0_13] : memref<1x4x256x1xf32, #tpu.memory_space<vmem>>, vector<1x1x256x1xf32>
    %15 = vector.shape_cast %14 : vector<1x1x256x1xf32> to vector<256x1xf32>
    %16 = vector.shape_cast %13 : vector<256x1xf32> to vector<1x1x256x1xf32>
    tpu.vector_store %arg4[%c0_11, %c2, %c0_12, %c0_13], %16 {strides = array<i32>} : memref<1x4x256x1xf32, #tpu.memory_space<vmem>>, vector<1x1x256x1xf32>,
    %17 = vector.extract_strided_slice %4 {offsets = [0, 3], sizes = [256, 1], strides = [1, 1]} : vector<256x4xf32> to vector<256x1xf32>
    %c0_14 = arith.constant 0 : index
    %c3 = arith.constant 3 : index
    %c0_15 = arith.constant 0 : index
    %c0_16 = arith.constant 0 : index
    %18 = vector.load %arg4[%c0_14, %c3, %c0_15, %c0_16] : memref<1x4x256x1xf32, #tpu.memory_space<vmem>>, vector<1x1x256x1xf32>
    %19 = vector.shape_cast %18 : vector<1x1x256x1xf32> to vector<256x1xf32>
    %20 = vector.shape_cast %17 : vector<256x1xf32> to vector<1x1x256x1xf32>
    tpu.vector_store %arg4[%c0_14, %c3, %c0_15, %c0_16], %20 {strides = array<i32>} : memref<1x4x256x1xf32, #tpu.memory_space<vmem>>, vector<1x1x256x1xf32>,
    return
  }
  func.func @transform_0(%arg0: i32, %arg1: i32) -> (i32, i32, i32) {
    %c0_i32 = arith.constant 0 : i32
    %c0_i32_0 = arith.constant 0 : i32
    return %arg0, %c0_i32, %arg1 : i32, i32, i32
  }
  func.func @transform_1(%arg0: i32, %arg1: i32) -> (i32, i32) {
    %c0_i32 = arith.constant 0 : i32
    %c0_i32_0 = arith.constant 0 : i32
    %c0_i32_1 = arith.constant 0 : i32
    return %c0_i32, %c0_i32_0 : i32, i32
  }
  func.func @transform_2(%arg0: i32, %arg1: i32) -> (i32, i32, i32, i32) {
    %c0_i32 = arith.constant 0 : i32
    %c0_i32_0 = arith.constant 0 : i32
    %c0_i32_1 = arith.constant 0 : i32
    return %arg0, %c0_i32, %arg1, %c0_i32_0 : i32, i32, i32, i32
  }
}

</mosaic_0001>

<bundles_post_ra>
// kernel: tpu_custom_call.1
= control target key start
LH: loop header
LB: loop body
LE: loop exit
PB: predicated region body
PF: predicated region fallthrough
CT: control target
= control target key end

     0   :  { %7 = vsyncpa [#allocation3], 0  ;;  %s1984_s0 = inlined_call_operand.hbm [shape: f32[2,8,256], index: 0, kind: input, shape index: {}]   ;;  %s1985_s1 = inlined_call_operand.vmem [shape: f32[8,4], index: 1, kind: input, shape index: {}]   ;;  %s1986_s2 = inlined_call_operand.vmem [shape: f32[2,4,256,1], index: 2, kind: output, shape index: {}]  }
   0x1   :  { %9 = vsyncpa [#allocation3 + $0x1], 0  ;;  %s1321_s9 = smov 0   ;;  %s1323_s10 = smov 0  }
   0x2   :  { %s1325_s11 = smov 0   ;;  %s1327_s12 = smov 0  }
   0x3   :  { %s1329_s13 = smov 0   ;;  %s1331_s14 = smov 0  }
   0x4 LB: > { %s1016_s15 = sadd.s32 4294967295, %s1301_s14   ;;  %s27_s16 = sadd.s32 1, %s1297_s13  ;;  %s1301_s14 = sphi %s1331_s14, %s15_s14   ;;  %s1297_s13 = sphi %s1329_s13, %s1993_s13   ;;  %s1293_s12 = sphi %s1327_s12, %s1992_s12   ;;  %s1289_s11 = sphi %s1325_s11, %s1991_s11   ;;  %s1285_s10 = sphi %s1323_s10, %s1990_s10   ;;  %s1281_s9 = sphi %s1321_s9, %s1989_s9  }
   0x5   : > { %p29_p0 = scmp.ge.s32.totalorder %s27_s16, 2  ;;  %s36_s17 = sadd.s32 1, %s1289_s11 }
   0x6   : > { %p43_p1 = scmp.ne.s32.totalorder %s1289_s11, %s1285_s10  ;;  %p44_p2 = scmp.eq.s32.totalorder %s1301_s14, 0 }
   0x7   : > { %s1995_s16 = smov (%p29_p0, %s27_s16), 0  ;;  %p49_p4 = scmp.ne.s32.totalorder %s1285_s10, %s1281_s9 }
   0x8   : > { %p1357_p3 = por %p44_p2, %p43_p1  ;;  %s31_s19 = ssub.s32 %s1297_s13, %s1995_s16 }
   0x9   : > { %p50_p5 = scmp.eq.s32.totalorder %s1016_s15, 0  ;;  %p34_p6 = scmp.eq.s32.totalorder %s31_s19, 0 }
   0xa   : > { %p1168_p8 = scmp.lt.s32.totalorder %s1301_s14, 2  ;;  %s125_s22 = sand.u32 1, %s1289_s11  }
   0xb   : > { %p1364_p7 = por %p50_p5, %p49_p4  ;;  %s1157_s23 = sshll.u32 %s1297_s13, 4 }
   0xc   : > { %s1370_s21 = scalar_select %p34_p6, %s1289_s11, %s36_s17  }
   0xd   : > { %s1020_s24 = sshll.u32 %s125_s22, 4  ;;  %s136_s27 = scalar_lea.hbm %s1984_s0, %s1157_s23 }
   0xe   : > { %s138_s28 = sshll.u32 %s136_s27, 4  ;;  %s129_s29 = scalar_lea.vmem [#allocation2], %s1020_s24  ;;  %s139_s28 = int_to_ptr.hbm [resolvable:$true] %s138_s28 }
   0xf   : > { %s140_s30 = sshll.u32 %s129_s29, 4  ;;  %p1165_p9 = pnand %p1168_p8, %p1357_p3  ;;  %s141_s30 = int_to_ptr.vmem [resolvable:$true] %s140_s30 }
  0x10   : > { %p1023_p10 = scmp.ge.s32.totalorder %s1301_s14, 1  ;;  %p145_p11 = scmp.lt.s32.totalorder %s1301_s14, 3 }
  0x11   : > { %s126_s3 = scalar_lea.sflag [#allocation3], %s125_s22 }
  0x12   : > { %1167 = dma.hbm_to_vmem [thread:$0]  (!%p1165_p9), %s139_s28, 256, %s141_s30, %s126_s3  }
  0x13   : > { %p146_p12 = pnand %p1023_p10, %p145_p11 }
  0x14   : > { %s151_s4 = sand.u32 (!%p146_p12), 1, %s1285_s10  }
  0x15   : > { %149 = sbr.rel (%p146_p12) target bundleno = 921 (0x399), region = 28  ;;  %s1024_s5 = sshll.u32 (!%p146_p12), %s151_s4, 4 }
  0x16   : > { %s152_s6 = scalar_lea.sflag (!%p146_p12), [#allocation3], %s151_s4  ;;  %s155_s7 = scalar_lea.vmem (!%p146_p12), [#allocation2], %s1024_s5 }
  0x1a   : > { %1276 = dma.done.wait (%p1364_p7), %s152_s6, 256  }
  0x1b   : > { %1278 = vsyncadd (%p1364_p7), %s152_s6, 4294967040  ;;  %v192_v0 = vld [vmem:[%s155_s7] sm:$0xff]  ;;  %v193_v2 = vld [vmem:[%s155_s7 + $0x8] sm:$0xff]  ;;  %vm259_vm0 = vcmask 64512   ;;  %p183_p13 = scmp.lt.s32.totalorder %s1293_s12, 1  ;;  %vm469_vm1 = vcmask 7168  }
  0x1c   : > { %194 = vxpose.xlu0.b32.start.end [1/1] (short) %v192_v0, 128  ;;  %v258_v1 = vld [vmem:[%s1985_s1] sm:$0xff]  ;;  %s1303_s20 = smov 127   ;;  %s1305_s22 = smov 125  }
  0x1d   : > { %371 = vmatpush.msra.mxu0 %v258_v1  ;;  %1159 = vmatpush.msra.mxu1 %v258_v1  ;;  %s1997_s12 = smov (!%p183_p13, %s1293_s12), 1 }
  0x1e   : > { %1160 = vmatpush.msra.mxu2 %v258_v1  ;;  %1161 = vmatpush.msra.mxu3 %v258_v1  ;;  %s1158_s15 = sshll.u32 %s1997_s12, 10  ;;  %s1304_s12 = smov 126  }
  0x1f   : > { %s1410_s19 = scalar_lea.vmem %s1986_s2, %s1158_s15 }
  0x9c   : > { %226 = vxpose.xlu0.b32.start.end [1/1] (short) %v193_v2, 128 }
  0xc0   : > { %v210_v3 = vpop.trf.xlu0 }
  0xc1   : > { %1027 = vmatmul.msk.f32.vlgmr.msra.gmra.mxu0 %vm259_vm0, %v210_v3 }
  0xc8   : > { %v211_v4 = vpop.trf.xlu0 }
  0xc9   : > { %1028 = vmatmul.msk.f32.gmra.mxu0 %vm259_vm0, %v211_v4 }
  0xd0   : > { %v212_v5 = vpop.trf.xlu0 }
  0xd1   : > { %1029 = vmatmul.msk.f32.gmra.mxu0 %vm259_vm0, %v212_v5 }
  0xd8   : > { %v213_v6 = vpop.trf.xlu0 }
  0xd9   : > { %1030 = vmatmul.msk.f32.gmra.mxu0 %vm259_vm0, %v213_v6 }
  0xe0   : > { %v214_v7 = vpop.trf.xlu0 }
  0xe1   : > { %1031 = vmatmul.msk.f32.gmra.mxu0 %vm259_vm0, %v214_v7 }
  0xe8   : > { %v215_v8 = vpop.trf.xlu0 }
  0xe9   : > { %1032 = vmatmul.msk.f32.gmra.mxu0 %vm259_vm0, %v215_v8 }
  0xf0   : > { %v216_v9 = vpop.trf.xlu0 }
  0xf1   : > { %1033 = vmatmul.msk.f32.gmra.mxu0 %vm259_vm0, %v216_v9 }
  0xf8   : > { %v217_v10 = vpop.trf.xlu0 }
  0xf9   : > { %1034 = vmatmul.msk.f32.gmra.mxu0 %vm259_vm0, %v217_v10 }
 0x100   : > { %v218_v11 = vpop.trf.xlu0 }
 0x101   : > { %1035 = vmatmul.msk.f32.vlgmr.msra.gmra.mxu1 %vm259_vm0, %v218_v11 }
 0x108   : > { %v219_v12 = vpop.trf.xlu0 }
 0x109   : > { %1036 = vmatmul.msk.f32.gmra.mxu1 %vm259_vm0, %v219_v12 }
 0x110   : > { %v220_v13 = vpop.trf.xlu0 }
 0x111   : > { %1037 = vmatmul.msk.f32.gmra.mxu1 %vm259_vm0, %v220_v13 }
 0x118   : > { %v221_v14 = vpop.trf.xlu0 }
 0x119   : > { %1038 = vmatmul.msk.f32.gmra.mxu1 %vm259_vm0, %v221_v14 }
 0x120   : > { %v222_v15 = vpop.trf.xlu0 }
 0x121   : > { %1039 = vmatmul.msk.f32.gmra.mxu1 %vm259_vm0, %v222_v15 }
 0x128   : > { %v223_v16 = vpop.trf.xlu0 }
 0x129   : > { %1040 = vmatmul.msk.f32.gmra.mxu1 %vm259_vm0, %v223_v16 }
 0x130   : > { %v224_v17 = vpop.trf.xlu0 }
 0x131   : > { %1041 = vmatmul.msk.f32.gmra.mxu1 %vm259_vm0, %v224_v17 }
 0x138   : > { %v225_v18 = vpop.trf.xlu0 }
 0x139   : > { %1042 = vmatmul.msk.f32.gmra.mxu1 %vm259_vm0, %v225_v18 }
 0x13e   : > { %v1412_v19 = vpop.f32.mrf.mxu0 }
 0x13f   : > { %470 = vst.msk [vmem:[%s1410_s19] sm:$0xff] %vm469_vm1, %v1412_v19  ;;  %534 = vrot.lane.b32.xlu1 %v1412_v19, %s1303_s20 }
 0x140   : > { %v242_v20 = vpop.trf.xlu0 }
 0x141   : > { %1043 = vmatmul.msk.f32.vlgmr.msra.gmra.mxu2 %vm259_vm0, %v242_v20 }
 0x146   : > { %v1420_v21 = vpop.f32.mrf.mxu0 }
 0x147   : > { %471 = vst.msk [vmem:[%s1410_s19 + $0x8] sm:$0xff] %vm469_vm1, %v1420_v21  ;;  %663 = vrot.lane.b32.xlu1 %v1412_v19, %s1304_s12  ;;  %665 = vrot.lane.b32.xlu2 %v1420_v21, %s1304_s12 }
 0x148   : > { %v243_v22 = vpop.trf.xlu0 }
 0x149   : > { %1044 = vmatmul.msk.f32.gmra.mxu2 %vm259_vm0, %v243_v22 }
 0x14e   : > { %v1430_v23 = vpop.f32.mrf.mxu0 }
 0x14f   : > { %472 = vst.msk [vmem:[%s1410_s19 + $0x10] sm:$0xff] %vm469_vm1, %v1430_v23 }
 0x150   : > { %v244_v24 = vpop.trf.xlu0 }
 0x151   : > { %1045 = vmatmul.msk.f32.gmra.mxu2 %vm259_vm0, %v244_v24 }
 0x156   : > { %v1436_v25 = vpop.f32.mrf.mxu0 }
 0x157   : > { %473 = vst.msk [vmem:[%s1410_s19 + $0x18] sm:$0xff] %vm469_vm1, %v1436_v25 }
 0x158   : > { %v245_v26 = vpop.trf.xlu0 }
 0x159   : > { %1046 = vmatmul.msk.f32.gmra.mxu2 %vm259_vm0, %v245_v26 }
 0x15e   : > { %v1442_v27 = vpop.f32.mrf.mxu0 }
 0x15f   : > { %474 = vst.msk [vmem:[%s1410_s19 + $0x20] sm:$0xff] %vm469_vm1, %v1442_v27 }
 0x160   : > { %v246_v29 = vpop.trf.xlu0 }
 0x161   : > { %1047 = vmatmul.msk.f32.gmra.mxu2 %vm259_vm0, %v246_v29 }
 0x166   : > { %v1447_v28 = vpop.f32.mrf.mxu0 }
 0x167   : > { %475 = vst.msk [vmem:[%s1410_s19 + $0x28] sm:$0xff] %vm469_vm1, %v1447_v28 }
 0x168   : > { %v247_v32 = vpop.trf.xlu0 }
 0x169   : > { %1048 = vmatmul.msk.f32.gmra.mxu2 %vm259_vm0, %v247_v32 }
 0x16e   : > { %v1453_v30 = vpop.f32.mrf.mxu0 }
 0x16f   : > { %476 = vst.msk [vmem:[%s1410_s19 + $0x30] sm:$0xff] %vm469_vm1, %v1453_v30 }
 0x170   : > { %v248_v34 = vpop.trf.xlu0 }
 0x171   : > { %1049 = vmatmul.msk.f32.gmra.mxu2 %vm259_vm0, %v248_v34 }
 0x176   : > { %v1458_v31 = vpop.f32.mrf.mxu0 }
 0x177   : > { %477 = vst.msk [vmem:[%s1410_s19 + $0x38] sm:$0xff] %vm469_vm1, %v1458_v31 }
 0x178   : > { %v249_v36 = vpop.trf.xlu0 }
 0x179   : > { %1050 = vmatmul.msk.f32.gmra.mxu2 %vm259_vm0, %v249_v36 }
 0x17e   : > { %v1464_v33 = vpop.f32.mrf.mxu1 }
 0x17f   : > { %478 = vst.msk [vmem:[%s1410_s19 + $0x40] sm:$0xff] %vm469_vm1, %v1464_v33 }
 0x180   : > { %v250_v38 = vpop.trf.xlu0 }
 0x181   : > { %1051 = vmatmul.msk.f32.vlgmr.msra.gmra.mxu3 %vm259_vm0, %v250_v38 }
 0x182   : > { %667 = vrot.lane.b32.xlu0 %v1430_v23, %s1304_s12 }
 0x186   : > { %v1472_v35 = vpop.f32.mrf.mxu1 }
 0x187   : > { %479 = vst.msk [vmem:[%s1410_s19 + $0x48] sm:$0xff] %vm469_vm1, %v1472_v35 }
 0x188   : > { %v251_v40 = vpop.trf.xlu0 }
 0x189   : > { %1052 = vmatmul.msk.f32.gmra.mxu3 %vm259_vm0, %v251_v40 }
 0x18e   : > { %v1478_v37 = vpop.f32.mrf.mxu1 }
 0x18f   : > { %480 = vst.msk [vmem:[%s1410_s19 + $0x50] sm:$0xff] %vm469_vm1, %v1478_v37 }
 0x190   : > { %v252_v43 = vpop.trf.xlu0 }
 0x191   : > { %1053 = vmatmul.msk.f32.gmra.mxu3 %vm259_vm0, %v252_v43 }
 0x196   : > { %v1484_v39 = vpop.f32.mrf.mxu1 }
 0x197   : > { %481 = vst.msk [vmem:[%s1410_s19 + $0x58] sm:$0xff] %vm469_vm1, %v1484_v39 }
 0x198   : > { %v253_v45 = vpop.trf.xlu0 }
 0x199   : > { %1054 = vmatmul.msk.f32.gmra.mxu3 %vm259_vm0, %v253_v45 }
 0x19e   : > { %v1490_v41 = vpop.f32.mrf.mxu1 }
 0x19f   : > { %482 = vst.msk [vmem:[%s1410_s19 + $0x60] sm:$0xff] %vm469_vm1, %v1490_v41 }
 0x1a0   : > { %v254_v48 = vpop.trf.xlu0 }
 0x1a1   : > { %v666_v42 = vpop.permute.xlu2 %665  ;;  %1055 = vmatmul.msk.f32.gmra.mxu3 %vm259_vm0, %v254_v48 }
 0x1a2   : > { %1092 = vst.msk [vmem:[%s1410_s19 + $0x208] sm:$0xff] %vm469_vm1, %v666_v42 }
 0x1a6   : > { %v1498_v44 = vpop.f32.mrf.mxu1 }
 0x1a7   : > { %483 = vst.msk [vmem:[%s1410_s19 + $0x68] sm:$0xff] %vm469_vm1, %v1498_v44 }
 0x1a8   : > { %v255_v51 = vpop.trf.xlu0 }
 0x1a9   : > { %1056 = vmatmul.msk.f32.gmra.mxu3 %vm259_vm0, %v255_v51 }
 0x1ae   : > { %v1504_v46 = vpop.f32.mrf.mxu1 }
 0x1af   : > { %484 = vst.msk [vmem:[%s1410_s19 + $0x70] sm:$0xff] %vm469_vm1, %v1504_v46 }
 0x1b0   : > { %v256_v53 = vpop.trf.xlu0 }
 0x1b1   : > { %v535_v47 = vpop.permute.xlu1 %534  ;;  %1057 = vmatmul.msk.f32.gmra.mxu3 %vm259_vm0, %v256_v53 }
 0x1b2   : > { %1059 = vst.msk [vmem:[%s1410_s19 + $0x100] sm:$0xff] %vm469_vm1, %v535_v47 }
 0x1b6   : > { %v1512_v49 = vpop.f32.mrf.mxu1 }
 0x1b7   : > { %485 = vst.msk [vmem:[%s1410_s19 + $0x78] sm:$0xff] %vm469_vm1, %v1512_v49 }
 0x1b8   : > { %v257_v55 = vpop.trf.xlu0 }
 0x1b9   : > { %v664_v50 = vpop.permute.xlu1 %663  ;;  %1058 = vmatmul.msk.f32.gmra.mxu3 %vm259_vm0, %v257_v55 }
 0x1ba   : > { %1091 = vst.msk [vmem:[%s1410_s19 + $0x200] sm:$0xff] %vm469_vm1, %v664_v50 }
 0x1c4   : > { %v1520_v52 = vpop.f32.mrf.mxu2 }
 0x1c5   : > { %486 = vst.msk [vmem:[%s1410_s19 + $0x80] sm:$0xff] %vm469_vm1, %v1520_v52  ;;  %566 = vrot.lane.b32.xlu1 %v1520_v52, %s1303_s20 }
 0x1cc   : > { %v1528_v54 = vpop.f32.mrf.mxu2 }
 0x1cd   : > { %487 = vst.msk [vmem:[%s1410_s19 + $0x88] sm:$0xff] %vm469_vm1, %v1528_v54  ;;  %536 = vrot.lane.b32.xlu1 %v1420_v21, %s1303_s20  ;;  %568 = vrot.lane.b32.xlu2 %v1528_v54, %s1303_s20 }
 0x1d4   : > { %v1538_v56 = vpop.f32.mrf.mxu2 }
 0x1d5   : > { %697 = vrot.lane.b32.xlu1 %v1528_v54, %s1304_s12  ;;  %538 = vrot.lane.b32.xlu2 %v1430_v23, %s1303_s20  ;;  %488 = vst.msk [vmem:[%s1410_s19 + $0x90] sm:$0xff] %vm469_vm1, %v1538_v56 }
 0x1dc   : > { %v1547_v57 = vpop.f32.mrf.mxu2 }
 0x1dd   : > { %794 = vrot.lane.b32.xlu1 %v1420_v21, %s1305_s22  ;;  %695 = vrot.lane.b32.xlu2 %v1520_v52, %s1304_s12  ;;  %489 = vst.msk [vmem:[%s1410_s19 + $0x98] sm:$0xff] %vm469_vm1, %v1547_v57 }
 0x1e4   : > { %v1560_v58 = vpop.f32.mrf.mxu2 }
 0x1e5   : > { %792 = vrot.lane.b32.xlu2 %v1412_v19, %s1305_s22  ;;  %570 = vrot.lane.b32.xlu1 %v1538_v56, %s1303_s20  ;;  %490 = vst.msk [vmem:[%s1410_s19 + $0xa0] sm:$0xff] %vm469_vm1, %v1560_v58 }
 0x1ec   : > { %v1579_v60 = vpop.f32.mrf.mxu2 }
 0x1ed   : > { %796 = vrot.lane.b32.xlu2 %v1430_v23, %s1305_s22  ;;  %669 = vrot.lane.b32.xlu1 %v1436_v25, %s1304_s12  ;;  %491 = vst.msk [vmem:[%s1410_s19 + $0xa8] sm:$0xff] %vm469_vm1, %v1579_v60 }
 0x1f4   : > { %v668_v59 = vpop.permute.xlu0 %667  ;;  %v1592_v61 = vpop.f32.mrf.mxu2 }
 0x1f5   : > { %1093 = vst.msk [vmem:[%s1410_s19 + $0x210] sm:$0xff] %vm469_vm1, %v668_v59  ;;  %699 = vrot.lane.b32.xlu2 %v1538_v56, %s1304_s12  ;;  %798 = vrot.lane.b32.xlu1 %v1436_v25, %s1305_s22 }
 0x1f6   : > { %492 = vst.msk [vmem:[%s1410_s19 + $0xb0] sm:$0xff] %vm469_vm1, %v1592_v61 }
 0x1fc   : > { %v1611_v63 = vpop.f32.mrf.mxu2 }
 0x1fd   : > { %540 = vrot.lane.b32.xlu2 %v1436_v25, %s1303_s20  ;;  %701 = vrot.lane.b32.xlu1 %v1547_v57, %s1304_s12  ;;  %493 = vst.msk [vmem:[%s1410_s19 + $0xb8] sm:$0xff] %vm469_vm1, %v1611_v63 }
 0x204   : > { %v1630_v3 = vpop.f32.mrf.mxu3 }
 0x205   : > { %542 = vrot.lane.b32.xlu1 %v1442_v27, %s1303_s20  ;;  %572 = vrot.lane.b32.xlu2 %v1547_v57, %s1303_s20  ;;  %494 = vst.msk [vmem:[%s1410_s19 + $0xc0] sm:$0xff] %vm469_vm1, %v1630_v3 }
 0x20c   : > { %v1659_v10 = vpop.f32.mrf.mxu3 }
 0x20d   : > { %671 = vrot.lane.b32.xlu2 %v1442_v27, %s1304_s12  ;;  %574 = vrot.lane.b32.xlu1 %v1560_v58, %s1303_s20  ;;  %495 = vst.msk [vmem:[%s1410_s19 + $0xc8] sm:$0xff] %vm469_vm1, %v1659_v10 }
 0x214   : > { %v1680_v15 = vpop.f32.mrf.mxu3 }
 0x215   : > { %800 = vrot.lane.b32.xlu2 %v1442_v27, %s1305_s22  ;;  %673 = vrot.lane.b32.xlu1 %v1447_v28, %s1304_s12  ;;  %496 = vst.msk [vmem:[%s1410_s19 + $0xd0] sm:$0xff] %vm469_vm1, %v1680_v15 }
 0x21c   : > { %v1709_v22 = vpop.f32.mrf.mxu3 }
 0x21d   : > { %703 = vrot.lane.b32.xlu2 %v1560_v58, %s1304_s12  ;;  %802 = vrot.lane.b32.xlu1 %v1447_v28, %s1305_s22  ;;  %497 = vst.msk [vmem:[%s1410_s19 + $0xd8] sm:$0xff] %vm469_vm1, %v1709_v22 }
 0x224   : > { %v1730_v27 = vpop.f32.mrf.mxu3 }
 0x225   : > { %544 = vrot.lane.b32.xlu2 %v1447_v28, %s1303_s20  ;;  %705 = vrot.lane.b32.xlu1 %v1579_v60, %s1304_s12  ;;  %498 = vst.msk [vmem:[%s1410_s19 + $0xe0] sm:$0xff] %vm469_vm1, %v1730_v27 }
 0x227   : > { %v569_v62 = vpop.permute.xlu2 %568 }
 0x228   : > { %1076 = vst.msk [vmem:[%s1410_s19 + $0x188] sm:$0xff] %vm469_vm1, %v569_v62 }
 0x22c   : > { %v460_v34 = vpop.f32.mrf.mxu3 }
 0x22d   : > { %546 = vrot.lane.b32.xlu1 %v1453_v30, %s1303_s20  ;;  %576 = vrot.lane.b32.xlu2 %v1579_v60, %s1303_s20  ;;  %499 = vst.msk [vmem:[%s1410_s19 + $0xe8] sm:$0xff] %vm469_vm1, %v460_v34 }
 0x22e   : > { %850 = vrot.lane.b32.xlu0 %v460_v34, %s1305_s22 }
 0x22f   : > { %v539_v0 = vpop.permute.xlu2 %538 }
 0x230   : > { %1061 = vst.msk [vmem:[%s1410_s19 + $0x110] sm:$0xff] %vm469_vm1, %v539_v0 }
 0x235   : > { %675 = vrot.lane.b32.xlu2 %v1453_v30, %s1304_s12  ;;  %578 = vrot.lane.b32.xlu1 %v1592_v61, %s1303_s20 }
 0x237   : > { %v567_v1 = vpop.permute.xlu1 %566  ;;  %v696_v2 = vpop.permute.xlu2 %695 }
 0x238   : > { %1075 = vst.msk [vmem:[%s1410_s19 + $0x180] sm:$0xff] %vm469_vm1, %v567_v1 }
 0x239   : > { %1107 = vst.msk [vmem:[%s1410_s19 + $0x280] sm:$0xff] %vm469_vm1, %v696_v2 }
 0x23d   : > { %804 = vrot.lane.b32.xlu2 %v1453_v30, %s1305_s22  ;;  %677 = vrot.lane.b32.xlu1 %v1458_v31, %s1304_s12 }
 0x23f   : > { %v537_v4 = vpop.permute.xlu1 %536  ;;  %v793_v5 = vpop.permute.xlu2 %792 }
 0x240   : > { %1060 = vst.msk [vmem:[%s1410_s19 + $0x108] sm:$0xff] %vm469_vm1, %v537_v4 }
 0x241   : > { %1123 = vst.msk [vmem:[%s1410_s19 + $0x300] sm:$0xff] %vm469_vm1, %v793_v5 }
 0x245   : > { %707 = vrot.lane.b32.xlu2 %v1592_v61, %s1304_s12  ;;  %806 = vrot.lane.b32.xlu1 %v1458_v31, %s1305_s22 }
 0x247   : > { %v698_v6 = vpop.permute.xlu1 %697  ;;  %v797_v7 = vpop.permute.xlu2 %796 }
 0x248   : > { %1108 = vst.msk [vmem:[%s1410_s19 + $0x288] sm:$0xff] %vm469_vm1, %v698_v6 }
 0x249   : > { %1125 = vst.msk [vmem:[%s1410_s19 + $0x310] sm:$0xff] %vm469_vm1, %v797_v7 }
 0x24d   : > { %548 = vrot.lane.b32.xlu2 %v1458_v31, %s1303_s20  ;;  %709 = vrot.lane.b32.xlu1 %v1611_v63, %s1304_s12 }
 0x24f   : > { %v795_v8 = vpop.permute.xlu1 %794  ;;  %v700_v9 = vpop.permute.xlu2 %699 }
 0x250   : > { %1124 = vst.msk [vmem:[%s1410_s19 + $0x308] sm:$0xff] %vm469_vm1, %v795_v8 }
 0x251   : > { %1109 = vst.msk [vmem:[%s1410_s19 + $0x290] sm:$0xff] %vm469_vm1, %v700_v9 }
 0x255   : > { %550 = vrot.lane.b32.xlu1 %v1464_v33, %s1303_s20  ;;  %580 = vrot.lane.b32.xlu2 %v1611_v63, %s1303_s20 }
 0x257   : > { %v541_v11 = vpop.permute.xlu2 %540  ;;  %v571_v12 = vpop.permute.xlu1 %570 }
 0x258   : > { %1062 = vst.msk [vmem:[%s1410_s19 + $0x118] sm:$0xff] %vm469_vm1, %v541_v11 }
 0x259   : > { %1077 = vst.msk [vmem:[%s1410_s19 + $0x190] sm:$0xff] %vm469_vm1, %v571_v12 }
 0x25d   : > { %679 = vrot.lane.b32.xlu2 %v1464_v33, %s1304_s12  ;;  %582 = vrot.lane.b32.xlu1 %v1630_v3, %s1303_s20 }
 0x25f   : > { %v670_v13 = vpop.permute.xlu1 %669  ;;  %v573_v14 = vpop.permute.xlu2 %572 }
 0x260   : > { %1094 = vst.msk [vmem:[%s1410_s19 + $0x218] sm:$0xff] %vm469_vm1, %v670_v13 }
 0x261   : > { %1078 = vst.msk [vmem:[%s1410_s19 + $0x198] sm:$0xff] %vm469_vm1, %v573_v14 }
 0x265   : > { %808 = vrot.lane.b32.xlu2 %v1464_v33, %s1305_s22  ;;  %681 = vrot.lane.b32.xlu1 %v1472_v35, %s1304_s12 }
 0x267   : > { %v799_v16 = vpop.permute.xlu1 %798  ;;  %v672_v17 = vpop.permute.xlu2 %671 }
 0x268   : > { %1126 = vst.msk [vmem:[%s1410_s19 + $0x318] sm:$0xff] %vm469_vm1, %v799_v16 }
 0x269   : > { %1095 = vst.msk [vmem:[%s1410_s19 + $0x220] sm:$0xff] %vm469_vm1, %v672_v17 }
 0x26d   : > { %711 = vrot.lane.b32.xlu2 %v1630_v3, %s1304_s12  ;;  %810 = vrot.lane.b32.xlu1 %v1472_v35, %s1305_s22 }
 0x26f   : > { %v702_v18 = vpop.permute.xlu1 %701  ;;  %v801_v19 = vpop.permute.xlu2 %800 }
 0x270   : > { %1110 = vst.msk [vmem:[%s1410_s19 + $0x298] sm:$0xff] %vm469_vm1, %v702_v18 }
 0x271   : > { %1127 = vst.msk [vmem:[%s1410_s19 + $0x320] sm:$0xff] %vm469_vm1, %v801_v19 }
 0x275   : > { %552 = vrot.lane.b32.xlu2 %v1472_v35, %s1303_s20  ;;  %713 = vrot.lane.b32.xlu1 %v1659_v10, %s1304_s12 }
 0x277   : > { %v543_v20 = vpop.permute.xlu1 %542  ;;  %v704_v21 = vpop.permute.xlu2 %703 }
 0x278   : > { %1063 = vst.msk [vmem:[%s1410_s19 + $0x120] sm:$0xff] %vm469_vm1, %v543_v20 }
 0x279   : > { %1111 = vst.msk [vmem:[%s1410_s19 + $0x2a0] sm:$0xff] %vm469_vm1, %v704_v21 }
 0x27d   : > { %554 = vrot.lane.b32.xlu1 %v1478_v37, %s1303_s20  ;;  %584 = vrot.lane.b32.xlu2 %v1659_v10, %s1303_s20 }
 0x27f   : > { %v545_v23 = vpop.permute.xlu2 %544  ;;  %v575_v24 = vpop.permute.xlu1 %574 }
 0x280   : > { %1064 = vst.msk [vmem:[%s1410_s19 + $0x128] sm:$0xff] %vm469_vm1, %v545_v23 }
 0x281   : > { %1079 = vst.msk [vmem:[%s1410_s19 + $0x1a0] sm:$0xff] %vm469_vm1, %v575_v24 }
 0x285   : > { %683 = vrot.lane.b32.xlu2 %v1478_v37, %s1304_s12  ;;  %586 = vrot.lane.b32.xlu1 %v1680_v15, %s1303_s20 }
 0x287   : > { %v674_v25 = vpop.permute.xlu1 %673  ;;  %v577_v26 = vpop.permute.xlu2 %576 }
 0x288   : > { %1096 = vst.msk [vmem:[%s1410_s19 + $0x228] sm:$0xff] %vm469_vm1, %v674_v25 }
 0x289   : > { %1080 = vst.msk [vmem:[%s1410_s19 + $0x1a8] sm:$0xff] %vm469_vm1, %v577_v26 }
 0x28d   : > { %812 = vrot.lane.b32.xlu2 %v1478_v37, %s1305_s22  ;;  %685 = vrot.lane.b32.xlu1 %v1484_v39, %s1304_s12 }
 0x28f   : > { %v803_v28 = vpop.permute.xlu1 %802  ;;  %v676_v29 = vpop.permute.xlu2 %675 }
 0x290   : > { %1128 = vst.msk [vmem:[%s1410_s19 + $0x328] sm:$0xff] %vm469_vm1, %v803_v28 }
 0x291   : > { %1097 = vst.msk [vmem:[%s1410_s19 + $0x230] sm:$0xff] %vm469_vm1, %v676_v29 }
 0x295   : > { %715 = vrot.lane.b32.xlu2 %v1680_v15, %s1304_s12  ;;  %814 = vrot.lane.b32.xlu1 %v1484_v39, %s1305_s22 }
 0x297   : > { %v706_v30 = vpop.permute.xlu1 %705  ;;  %v805_v31 = vpop.permute.xlu2 %804 }
 0x298   : > { %1112 = vst.msk [vmem:[%s1410_s19 + $0x2a8] sm:$0xff] %vm469_vm1, %v706_v30 }
 0x299   : > { %1129 = vst.msk [vmem:[%s1410_s19 + $0x330] sm:$0xff] %vm469_vm1, %v805_v31 }
 0x29d   : > { %556 = vrot.lane.b32.xlu2 %v1484_v39, %s1303_s20  ;;  %717 = vrot.lane.b32.xlu1 %v1709_v22, %s1304_s12  ;;  %v1778_v39 = vpop.f32.mrf.mxu3 }
 0x29e   : > { %500 = vst.msk [vmem:[%s1410_s19 + $0xf0] sm:$0xff] %vm469_vm1, %v1778_v39 }
 0x29f   : > { %v547_v32 = vpop.permute.xlu1 %546  ;;  %v708_v33 = vpop.permute.xlu2 %707 }
 0x2a0   : > { %1065 = vst.msk [vmem:[%s1410_s19 + $0x130] sm:$0xff] %vm469_vm1, %v547_v32 }
 0x2a1   : > { %1113 = vst.msk [vmem:[%s1410_s19 + $0x2b0] sm:$0xff] %vm469_vm1, %v708_v33 }
 0x2a5   : > { %558 = vrot.lane.b32.xlu1 %v1490_v41, %s1303_s20  ;;  %588 = vrot.lane.b32.xlu2 %v1709_v22, %s1303_s20  ;;  %v1799_v45 = vpop.f32.mrf.mxu3 }
 0x2a6   : > { %501 = vst.msk [vmem:[%s1410_s19 + $0xf8] sm:$0xff] %vm469_vm1, %v1799_v45 }
 0x2a7   : > { %v549_v35 = vpop.permute.xlu2 %548  ;;  %v579_v36 = vpop.permute.xlu1 %578 }
 0x2a8   : > { %1066 = vst.msk [vmem:[%s1410_s19 + $0x138] sm:$0xff] %vm469_vm1, %v549_v35 }
 0x2a9   : > { %1081 = vst.msk [vmem:[%s1410_s19 + $0x1b0] sm:$0xff] %vm469_vm1, %v579_v36 }
 0x2ad   : > { %687 = vrot.lane.b32.xlu2 %v1490_v41, %s1304_s12  ;;  %590 = vrot.lane.b32.xlu1 %v1730_v27, %s1303_s20 }
 0x2af   : > { %v678_v37 = vpop.permute.xlu1 %677  ;;  %v581_v38 = vpop.permute.xlu2 %580 }
 0x2b0   : > { %1098 = vst.msk [vmem:[%s1410_s19 + $0x238] sm:$0xff] %vm469_vm1, %v678_v37 }
 0x2b1   : > { %1082 = vst.msk [vmem:[%s1410_s19 + $0x1b8] sm:$0xff] %vm469_vm1, %v581_v38 }
 0x2b5   : > { %816 = vrot.lane.b32.xlu2 %v1490_v41, %s1305_s22  ;;  %689 = vrot.lane.b32.xlu1 %v1498_v44, %s1304_s12 }
 0x2b7   : > { %v807_v40 = vpop.permute.xlu1 %806  ;;  %v680_v42 = vpop.permute.xlu2 %679 }
 0x2b8   : > { %1130 = vst.msk [vmem:[%s1410_s19 + $0x338] sm:$0xff] %vm469_vm1, %v807_v40 }
 0x2b9   : > { %1099 = vst.msk [vmem:[%s1410_s19 + $0x240] sm:$0xff] %vm469_vm1, %v680_v42 }
 0x2bd   : > { %719 = vrot.lane.b32.xlu2 %v1730_v27, %s1304_s12  ;;  %818 = vrot.lane.b32.xlu1 %v1498_v44, %s1305_s22 }
 0x2bf   : > { %v710_v43 = vpop.permute.xlu1 %709  ;;  %v809_v41 = vpop.permute.xlu2 %808 }
 0x2c0   : > { %1114 = vst.msk [vmem:[%s1410_s19 + $0x2b8] sm:$0xff] %vm469_vm1, %v710_v43 }
 0x2c1   : > { %1131 = vst.msk [vmem:[%s1410_s19 + $0x340] sm:$0xff] %vm469_vm1, %v809_v41 }
 0x2c5   : > { %560 = vrot.lane.b32.xlu2 %v1498_v44, %s1303_s20  ;;  %721 = vrot.lane.b32.xlu1 %v460_v34, %s1304_s12 }
 0x2c7   : > { %v551_v47 = vpop.permute.xlu1 %550  ;;  %v712_v48 = vpop.permute.xlu2 %711 }
 0x2c8   : > { %1067 = vst.msk [vmem:[%s1410_s19 + $0x140] sm:$0xff] %vm469_vm1, %v551_v47 }
 0x2c9   : > { %1115 = vst.msk [vmem:[%s1410_s19 + $0x2c0] sm:$0xff] %vm469_vm1, %v712_v48 }
 0x2cd   : > { %562 = vrot.lane.b32.xlu1 %v1504_v46, %s1303_s20  ;;  %592 = vrot.lane.b32.xlu2 %v460_v34, %s1303_s20 }
 0x2cf   : > { %v553_v50 = vpop.permute.xlu2 %552  ;;  %v583_v51 = vpop.permute.xlu1 %582 }
 0x2d0   : > { %1068 = vst.msk [vmem:[%s1410_s19 + $0x148] sm:$0xff] %vm469_vm1, %v553_v50 }
 0x2d1   : > { %1083 = vst.msk [vmem:[%s1410_s19 + $0x1c0] sm:$0xff] %vm469_vm1, %v583_v51 }
 0x2d5   : > { %691 = vrot.lane.b32.xlu2 %v1504_v46, %s1304_s12  ;;  %594 = vrot.lane.b32.xlu1 %v1778_v39, %s1303_s20 }
 0x2d7   : > { %v682_v44 = vpop.permute.xlu1 %681  ;;  %v585_v53 = vpop.permute.xlu2 %584 }
 0x2d8   : > { %1100 = vst.msk [vmem:[%s1410_s19 + $0x248] sm:$0xff] %vm469_vm1, %v682_v44 }
 0x2d9   : > { %1084 = vst.msk [vmem:[%s1410_s19 + $0x1c8] sm:$0xff] %vm469_vm1, %v585_v53 }
 0x2dd   : > { %820 = vrot.lane.b32.xlu2 %v1504_v46, %s1305_s22  ;;  %693 = vrot.lane.b32.xlu1 %v1512_v49, %s1304_s12 }
 0x2df   : > { %v811_v55 = vpop.permute.xlu1 %810  ;;  %v684_v59 = vpop.permute.xlu2 %683 }
 0x2e0   : > { %1132 = vst.msk [vmem:[%s1410_s19 + $0x348] sm:$0xff] %vm469_vm1, %v811_v55 }
 0x2e1   : > { %1101 = vst.msk [vmem:[%s1410_s19 + $0x250] sm:$0xff] %vm469_vm1, %v684_v59 }
 0x2e5   : > { %723 = vrot.lane.b32.xlu2 %v1778_v39, %s1304_s12  ;;  %725 = vrot.lane.b32.xlu1 %v1799_v45, %s1304_s12 }
 0x2e7   : > { %v714_v46 = vpop.permute.xlu1 %713  ;;  %v813_v62 = vpop.permute.xlu2 %812 }
 0x2e8   : > { %1116 = vst.msk [vmem:[%s1410_s19 + $0x2c8] sm:$0xff] %vm469_vm1, %v714_v46 }
 0x2e9   : > { %1133 = vst.msk [vmem:[%s1410_s19 + $0x350] sm:$0xff] %vm469_vm1, %v813_v62 }
 0x2ed   : > { %564 = vrot.lane.b32.xlu2 %v1512_v49, %s1303_s20  ;;  %822 = vrot.lane.b32.xlu1 %v1512_v49, %s1305_s22 }
 0x2ef   : > { %v555_v0 = vpop.permute.xlu1 %554  ;;  %v716_v1 = vpop.permute.xlu2 %715 }
 0x2f0   : > { %1069 = vst.msk [vmem:[%s1410_s19 + $0x150] sm:$0xff] %vm469_vm1, %v555_v0 }
 0x2f1   : > { %1117 = vst.msk [vmem:[%s1410_s19 + $0x2d0] sm:$0xff] %vm469_vm1, %v716_v1 }
 0x2f5   : > { %826 = vrot.lane.b32.xlu1 %v1528_v54, %s1305_s22  ;;  %596 = vrot.lane.b32.xlu2 %v1799_v45, %s1303_s20 }
 0x2f7   : > { %v557_v2 = vpop.permute.xlu2 %556  ;;  %v587_v4 = vpop.permute.xlu1 %586 }
 0x2f8   : > { %1070 = vst.msk [vmem:[%s1410_s19 + $0x158] sm:$0xff] %vm469_vm1, %v557_v2 }
 0x2f9   : > { %1085 = vst.msk [vmem:[%s1410_s19 + $0x1d0] sm:$0xff] %vm469_vm1, %v587_v4 }
 0x2fd   : > { %830 = vrot.lane.b32.xlu1 %v1547_v57, %s1305_s22  ;;  %824 = vrot.lane.b32.xlu2 %v1520_v52, %s1305_s22 }
 0x2ff   : > { %v686_v49 = vpop.permute.xlu1 %685  ;;  %v589_v54 = vpop.permute.xlu2 %588 }
 0x300   : > { %1102 = vst.msk [vmem:[%s1410_s19 + $0x258] sm:$0xff] %vm469_vm1, %v686_v49 }
 0x301   : > { %1086 = vst.msk [vmem:[%s1410_s19 + $0x1d8] sm:$0xff] %vm469_vm1, %v589_v54 }
 0x305   : > { %834 = vrot.lane.b32.xlu1 %v1579_v60, %s1305_s22  ;;  %828 = vrot.lane.b32.xlu2 %v1538_v56, %s1305_s22 }
 0x307   : > { %v815_v5 = vpop.permute.xlu1 %814  ;;  %v688_v57 = vpop.permute.xlu2 %687 }
 0x308   : > { %1134 = vst.msk [vmem:[%s1410_s19 + $0x358] sm:$0xff] %vm469_vm1, %v815_v5 }
 0x309   : > { %1103 = vst.msk [vmem:[%s1410_s19 + $0x260] sm:$0xff] %vm469_vm1, %v688_v57 }
 0x30d   : > { %838 = vrot.lane.b32.xlu1 %v1611_v63, %s1305_s22  ;;  %832 = vrot.lane.b32.xlu2 %v1560_v58, %s1305_s22  ;;  %v851_v58 = vpop.permute.xlu0 %850 }
 0x30e   : > { %1152 = vst.msk [vmem:[%s1410_s19 + $0x3e8] sm:$0xff] %vm469_vm1, %v851_v58 }
 0x30f   : > { %v718_v52 = vpop.permute.xlu1 %717  ;;  %v817_v60 = vpop.permute.xlu2 %816 }
 0x310   : > { %1118 = vst.msk [vmem:[%s1410_s19 + $0x2d8] sm:$0xff] %vm469_vm1, %v718_v52 }
 0x311   : > { %1135 = vst.msk [vmem:[%s1410_s19 + $0x360] sm:$0xff] %vm469_vm1, %v817_v60 }
 0x315   : > { %842 = vrot.lane.b32.xlu1 %v1659_v10, %s1305_s22  ;;  %836 = vrot.lane.b32.xlu2 %v1592_v61, %s1305_s22 }
 0x317   : > { %v559_v56 = vpop.permute.xlu1 %558  ;;  %v720_v63 = vpop.permute.xlu2 %719 }
 0x318   : > { %1071 = vst.msk [vmem:[%s1410_s19 + $0x160] sm:$0xff] %vm469_vm1, %v559_v56 }
 0x319   : > { %1119 = vst.msk [vmem:[%s1410_s19 + $0x2e0] sm:$0xff] %vm469_vm1, %v720_v63 }
 0x31d   : > { %846 = vrot.lane.b32.xlu1 %v1709_v22, %s1305_s22  ;;  %840 = vrot.lane.b32.xlu2 %v1630_v3, %s1305_s22 }
 0x31f   : > { %v561_v61 = vpop.permute.xlu2 %560  ;;  %v591_v6 = vpop.permute.xlu1 %590 }
 0x320   : > { %1072 = vst.msk [vmem:[%s1410_s19 + $0x168] sm:$0xff] %vm469_vm1, %v561_v61 }
 0x321   : > { %1087 = vst.msk [vmem:[%s1410_s19 + $0x1e0] sm:$0xff] %vm469_vm1, %v591_v6 }
 0x325   : > { %852 = vrot.lane.b32.xlu1 %v1778_v39, %s1305_s22  ;;  %844 = vrot.lane.b32.xlu2 %v1680_v15, %s1305_s22 }
 0x327   : > { %v690_v7 = vpop.permute.xlu1 %689  ;;  %v593_v8 = vpop.permute.xlu2 %592 }
 0x328   : > { %1104 = vst.msk [vmem:[%s1410_s19 + $0x268] sm:$0xff] %vm469_vm1, %v690_v7 }
 0x329   : > { %1088 = vst.msk [vmem:[%s1410_s19 + $0x1e8] sm:$0xff] %vm469_vm1, %v593_v8 }
 0x32d   : > { %848 = vrot.lane.b32.xlu2 %v1730_v27, %s1305_s22 }
 0x32f   : > { %v819_v3 = vpop.permute.xlu1 %818  ;;  %v692_v9 = vpop.permute.xlu2 %691 }
 0x330   : > { %1136 = vst.msk [vmem:[%s1410_s19 + $0x368] sm:$0xff] %vm469_vm1, %v819_v3 }
 0x331   : > { %1105 = vst.msk [vmem:[%s1410_s19 + $0x270] sm:$0xff] %vm469_vm1, %v692_v9 }
 0x335   : > { %854 = vrot.lane.b32.xlu2 %v1799_v45, %s1305_s22 }
 0x337   : > { %v722_v10 = vpop.permute.xlu1 %721  ;;  %v821_v11 = vpop.permute.xlu2 %820 }
 0x338   : > { %1120 = vst.msk [vmem:[%s1410_s19 + $0x2e8] sm:$0xff] %vm469_vm1, %v722_v10 }
 0x339   : > { %1137 = vst.msk [vmem:[%s1410_s19 + $0x370] sm:$0xff] %vm469_vm1, %v821_v11 }
 0x33f   : > { %v563_v12 = vpop.permute.xlu1 %562  ;;  %v724_v13 = vpop.permute.xlu2 %723 }
 0x340   : > { %1073 = vst.msk [vmem:[%s1410_s19 + $0x170] sm:$0xff] %vm469_vm1, %v563_v12 }
 0x341   : > { %1121 = vst.msk [vmem:[%s1410_s19 + $0x2f0] sm:$0xff] %vm469_vm1, %v724_v13 }
 0x347   : > { %v565_v14 = vpop.permute.xlu2 %564  ;;  %v595_v15 = vpop.permute.xlu1 %594 }
 0x348   : > { %1074 = vst.msk [vmem:[%s1410_s19 + $0x178] sm:$0xff] %vm469_vm1, %v565_v14 }
 0x349   : > { %1089 = vst.msk [vmem:[%s1410_s19 + $0x1f0] sm:$0xff] %vm469_vm1, %v595_v15 }
 0x34f   : > { %v694_v16 = vpop.permute.xlu1 %693  ;;  %v597_v17 = vpop.permute.xlu2 %596 }
 0x350   : > { %1106 = vst.msk [vmem:[%s1410_s19 + $0x278] sm:$0xff] %vm469_vm1, %v694_v16 }
 0x351   : > { %1090 = vst.msk [vmem:[%s1410_s19 + $0x1f8] sm:$0xff] %vm469_vm1, %v597_v17 }
 0x357   : > { %v726_v18 = vpop.permute.xlu1 %725  ;;  %v825_v19 = vpop.permute.xlu2 %824 }
 0x358   : > { %1122 = vst.msk [vmem:[%s1410_s19 + $0x2f8] sm:$0xff] %vm469_vm1, %v726_v18 }
 0x359   : > { %1139 = vst.msk [vmem:[%s1410_s19 + $0x380] sm:$0xff] %vm469_vm1, %v825_v19 }
 0x35f   : > { %v823_v20 = vpop.permute.xlu1 %822  ;;  %v829_v21 = vpop.permute.xlu2 %828 }
 0x360   : > { %1138 = vst.msk [vmem:[%s1410_s19 + $0x378] sm:$0xff] %vm469_vm1, %v823_v20 }
 0x361   : > { %1141 = vst.msk [vmem:[%s1410_s19 + $0x390] sm:$0xff] %vm469_vm1, %v829_v21 }
 0x367   : > { %v827_v22 = vpop.permute.xlu1 %826  ;;  %v833_v23 = vpop.permute.xlu2 %832 }
 0x368   : > { %1140 = vst.msk [vmem:[%s1410_s19 + $0x388] sm:$0xff] %vm469_vm1, %v827_v22 }
 0x369   : > { %1143 = vst.msk [vmem:[%s1410_s19 + $0x3a0] sm:$0xff] %vm469_vm1, %v833_v23 }
 0x36f   : > { %v831_v24 = vpop.permute.xlu1 %830  ;;  %v837_v25 = vpop.permute.xlu2 %836 }
 0x370   : > { %1142 = vst.msk [vmem:[%s1410_s19 + $0x398] sm:$0xff] %vm469_vm1, %v831_v24 }
 0x371   : > { %1145 = vst.msk [vmem:[%s1410_s19 + $0x3b0] sm:$0xff] %vm469_vm1, %v837_v25 }
 0x377   : > { %v835_v26 = vpop.permute.xlu1 %834  ;;  %v841_v27 = vpop.permute.xlu2 %840 }
 0x378   : > { %1144 = vst.msk [vmem:[%s1410_s19 + $0x3a8] sm:$0xff] %vm469_vm1, %v835_v26 }
 0x379   : > { %1147 = vst.msk [vmem:[%s1410_s19 + $0x3c0] sm:$0xff] %vm469_vm1, %v841_v27 }
 0x37f   : > { %v839_v28 = vpop.permute.xlu1 %838  ;;  %v845_v29 = vpop.permute.xlu2 %844 }
 0x380   : > { %1146 = vst.msk [vmem:[%s1410_s19 + $0x3b8] sm:$0xff] %vm469_vm1, %v839_v28 }
 0x381   : > { %1149 = vst.msk [vmem:[%s1410_s19 + $0x3d0] sm:$0xff] %vm469_vm1, %v845_v29 }
 0x387   : > { %v843_v30 = vpop.permute.xlu1 %842  ;;  %v849_v31 = vpop.permute.xlu2 %848 }
 0x388   : > { %1148 = vst.msk [vmem:[%s1410_s19 + $0x3c8] sm:$0xff] %vm469_vm1, %v843_v30 }
 0x389   : > { %1151 = vst.msk [vmem:[%s1410_s19 + $0x3e0] sm:$0xff] %vm469_vm1, %v849_v31 }
 0x38f   : > { %v847_v32 = vpop.permute.xlu1 %846  ;;  %v855_v33 = vpop.permute.xlu2 %854 }
 0x390   : > { %1150 = vst.msk [vmem:[%s1410_s19 + $0x3d8] sm:$0xff] %vm469_vm1, %v847_v32 }
 0x391   : > { %1154 = vst.msk [vmem:[%s1410_s19 + $0x3f8] sm:$0xff] %vm469_vm1, %v855_v33 }
 0x397   : > { %v853_v34 = vpop.permute.xlu1 %852 }
 0x398   : > { %1153 = vst.msk [vmem:[%s1410_s19 + $0x3f0] sm:$0xff] %vm469_vm1, %v853_v34 }
 0x399 PF: > { %s15_s14 = sadd.s32 1, %s1301_s14   ;;  %s1989_s9 = smov %s1285_s10 }
 0x39a   : > { %p12_p0 = scmp.ge.s32.totalorder %s15_s14, 4   ;;  %s1990_s10 = smov %s1289_s11 }
 0x39b   : > { %s1991_s11 = smov %s1370_s21  ;;  %s1992_s12 = smov %s1297_s13 }
 0x39c   : > { %s1993_s13 = smov %s1995_s16  ;;  %14 = sbr.rel (!%p12_p0) target bundleno = 4 (0x4), region = 71 }
 0x3a1   :  { %951 = vsyncpa [#allocation3], 1 }
 0x3a2   :  { %953 = vsyncpa [#allocation3 + $0x1], 1 }

</bundles_post_ra>
